<compile_context>
chip_gen: v5e
topology: v5e:2x2
jax: 0.10.0
libtpu: 0.0.40
codegen_flags: <defaults>
</compile_context>

<pallas_src>
import jax
import jax.numpy as jnp
from jax.experimental import pallas as pl
from jax.experimental.pallas import tpu as pltpu


def _initial_embedding_loss_kernel(x_ref, mask_ref, tgt_ref, valid_ref,
                                   part_ref, inv_ref):
    h = pl.program_id(1)

    m = mask_ref[0]       # [C, S]   bf16 pool masks (resident across H tiles)
    x = x_ref[0]          # [S, tH]  bf16 token embeddings (H tile)
    t = tgt_ref[0]        # [C, tH]  bf16 target embeddings (H tile)
    v = valid_ref[0]      # [C, 1]   f32 {0,1}

    @pl.when(h == 0)
    def _():
        # Hoisted once per batch element: token counts + safe reciprocal.
        counts = jnp.sum(m.astype(jnp.float32), axis=1, keepdims=True)   # [C,1]
        inv_ref[...] = pl.reciprocal(jnp.maximum(counts, 1.0), approx=False)
        part_ref[...] = jnp.zeros_like(part_ref)

    # Masked mean pooling over tokens: (m @ x) * (1/count), f32 accumulation.
    pooled = jnp.dot(m, x, preferred_element_type=jnp.float32) * inv_ref[...]
    diff = pooled - t.astype(jnp.float32)                                 # [C,tH]
    sse = jnp.sum(diff * diff, axis=1, keepdims=True)                     # [C,1]

    # Sum over concepts, skipping invalid ones; accumulate across H tiles in
    # the resident output block (scalar broadcast over the 128-lane row).
    part_ref[...] += jnp.sum(sse * v)


def _pick_h_tile(H):
    if H <= 512:
        return H
    for t in (512, 256, 128):
        if H % t == 0:
            return t
    return H   # fall back to the full (untiled) hidden dim


def initial_embedding_loss(output, masks, targets, valid):
    B, S, H = output.shape
    _, C, _ = masks.shape
    assert valid.shape == (B, C, 1)

    # No-ops when the caller already supplies bf16 (recommended); avoids the
    # old extra f32 HBM pass.
    output = output.astype(jnp.bfloat16)
    masks = masks.astype(jnp.bfloat16)
    targets = targets.astype(jnp.bfloat16)
    valid = valid.astype(jnp.float32)

    tH = _pick_h_tile(H)
    nH = H // tH

    # Advisory cost for XLA's scheduler.
    cost = pl.CostEstimate(
        flops=2 * B * C * S * H + 6 * B * C * H,
        transcendentals=0,
        bytes_accessed=(output.size + masks.size + targets.size) * 2
                       + valid.size * 4 + B * 128 * 4,
    )

    # VMEM budget: double-buffered input blocks + output row + scratch.
    blk_bytes = 2 * ((S * tH + C * S + C * tH) * 2 + C * 4 + 128 * 4) + C * 128 * 4
    vmem_limit = int(min(max(4 * blk_bytes + (1 << 20), 32 << 20), 64 << 20))

    partials = pl.pallas_call(
        _initial_embedding_loss_kernel,
        out_shape=jax.ShapeDtypeStruct((B, 1, 128), jnp.float32),
        grid_spec=pltpu.PrefetchScalarGridSpec(
            num_scalar_prefetch=0,
            grid=(B, nH),
            in_specs=[
                pl.BlockSpec((1, S, tH), lambda b, h: (b, 0, h)),
                pl.BlockSpec((1, C, S), lambda b, h: (b, 0, 0)),
                pl.BlockSpec((1, C, tH), lambda b, h: (b, 0, h)),
                pl.BlockSpec((1, C, 1), lambda b, h: (b, 0, 0)),
            ],
            out_specs=pl.BlockSpec((1, 1, 128), lambda b, h: (b, 0, 0)),
            scratch_shapes=[pltpu.VMEM((C, 1), jnp.float32)],
        ),
        compiler_params=pltpu.CompilerParams(
            dimension_semantics=("parallel", "arbitrary"),
            vmem_limit_bytes=vmem_limit,
        ),
        cost_estimate=cost,
    )(output, masks, targets, valid)

    # Finalize in plain JAX:  sum_b,c valid * mean_H(diff^2)  /  (B*C)
    return jnp.sum(partials[:, 0, 0]) / float(H * B * C)


def _reference(output, masks, targets, valid):
    """Plain-JAX (f32) reference mirroring the PyTorch loop semantics."""
    x = output.astype(jnp.float32)
    m = masks.astype(jnp.float32)
    t = targets.astype(jnp.float32)
    counts = m.sum(-1, keepdims=True)                                     # [B,C,1]
    pooled = jnp.einsum('bcs,bsh->bch', m, x) / jnp.maximum(counts, 1.0)  # [B,C,H]
    mse = jnp.mean((pooled - t) ** 2, axis=-1)                            # [B,C]
    total = masks.shape[0] * masks.shape[1]
    return jnp.sum(mse * valid[:, :, 0]) / total


if __name__ == "__main__":
    # Small deterministic example shapes.
    B, S, H, C = 2, 16, 32, 8

    key = jax.random.PRNGKey(0)
    k_out, k_mask, k_tgt, k_valid = jax.random.split(key, 4)

    # Token embeddings from the encoder ("output"), kept in bf16 end-to-end.
    output = jax.random.normal(k_out, (B, S, H), dtype=jnp.float32).astype(jnp.bfloat16)

    # Concept pool masks: guarantee at least one token per concept (an empty
    # selection would be NaN in the original PyTorch too).
    masks = jax.random.bernoulli(k_mask, p=0.4, shape=(B, C, S))
    masks = masks.at[:, :, 0].set(True).astype(jnp.bfloat16)

    # Deterministically "precomputed" initial sentence embeddings per concept
    # (stands in for InitialEmbeddingLoss.id_sentence_embedding lookups).
    targets = jax.random.normal(k_tgt, (B, C, H), dtype=jnp.float32).astype(jnp.bfloat16)

    # Which concept ids actually have a precomputed embedding (the
    # `if id not in ...: continue` branch).
    valid = jax.random.bernoulli(k_valid, p=0.8, shape=(B, C, 1)).astype(jnp.float32)

    loss = initial_embedding_loss(output, masks, targets, valid)
    loss = jax.block_until_ready(loss)

    ref = _reference(output, masks, targets, valid)
    assert jnp.allclose(loss, ref, rtol=1e-4, atol=1e-5), (loss, ref)

    print("KERNEL_OK")
</pallas_src>

<mosaic_0001>
module attributes {stable_mosaic.version = 11 : i64} {
  func.func @_initial_embedding_loss_kernel(%arg0: i32, %arg1: i32, %arg2: memref<1x16x32xbf16, #tpu.memory_space<vmem>>, %arg3: memref<1x8x16xbf16, #tpu.memory_space<vmem>>, %arg4: memref<1x8x32xbf16, #tpu.memory_space<vmem>>, %arg5: memref<1x8x1xf32, #tpu.memory_space<vmem>>, %arg6: memref<1x1x128xf32, #tpu.memory_space<vmem>>, %arg7: memref<8x1xf32, #tpu.memory_space<vmem>>) attributes {dimension_semantics = [#tpu.dimension_semantics<parallel>, #tpu.dimension_semantics<arbitrary>], iteration_bounds = array<i64: 2, 1>, scalar_prefetch = 0 : i64, scratch_operands = 1 : i64, tpu.core_type = #tpu.core_type<tc>, window_params = [{transform_indices = @transform_0, window_bounds = array<i64: 1, 16, 32>}, {transform_indices = @transform_1, window_bounds = array<i64: 1, 8, 16>}, {transform_indices = @transform_2, window_bounds = array<i64: 1, 8, 32>}, {transform_indices = @transform_3, window_bounds = array<i64: 1, 8, 1>}, {transform_indices = @transform_4, window_bounds = array<i64: 1, 1, 128>}]} {
    %c0 = arith.constant 0 : index
    %c0_0 = arith.constant 0 : index
    %c0_1 = arith.constant 0 : index
    %0 = vector.load %arg3[%c0, %c0_0, %c0_1] : memref<1x8x16xbf16, #tpu.memory_space<vmem>>, vector<1x8x16xbf16>
    %1 = vector.shape_cast %0 : vector<1x8x16xbf16> to vector<8x16xbf16>
    %c0_2 = arith.constant 0 : index
    %c0_3 = arith.constant 0 : index
    %c0_4 = arith.constant 0 : index
    %2 = vector.load %arg2[%c0_2, %c0_3, %c0_4] : memref<1x16x32xbf16, #tpu.memory_space<vmem>>, vector<1x16x32xbf16>
    %3 = vector.shape_cast %2 : vector<1x16x32xbf16> to vector<16x32xbf16>
    %c0_5 = arith.constant 0 : index
    %c0_6 = arith.constant 0 : index
    %c0_7 = arith.constant 0 : index
    %4 = vector.load %arg4[%c0_5, %c0_6, %c0_7] : memref<1x8x32xbf16, #tpu.memory_space<vmem>>, vector<1x8x32xbf16>
    %5 = vector.shape_cast %4 : vector<1x8x32xbf16> to vector<8x32xbf16>
    %c0_8 = arith.constant 0 : index
    %c0_9 = arith.constant 0 : index
    %c0_10 = arith.constant 0 : index
    %6 = vector.load %arg5[%c0_8, %c0_9, %c0_10] : memref<1x8x1xf32, #tpu.memory_space<vmem>>, vector<1x8x1xf32>
    %7 = vector.shape_cast %6 : vector<1x8x1xf32> to vector<8x1xf32>
    %c0_i32 = arith.constant 0 : i32
    %8 = arith.cmpi eq, %arg1, %c0_i32 : i32
    %9 = arith.extui %8 : i1 to i32
    %c0_i32_11 = arith.constant 0 : i32
    %10 = arith.cmpi ne, %9, %c0_i32_11 : i32
    scf.if %10 {
      %29 = arith.extf %1 : vector<8x16xbf16> to vector<8x16xf32>
      %cst_22 = arith.constant dense<0.000000e+00> : vector<8xf32>
      %30 = vector.multi_reduction <add>, %29, %cst_22 [1] : vector<8x16xf32> to vector<8xf32>
      %31 = vector.shape_cast %30 : vector<8xf32> to vector<8x1xf32>
      %cst_23 = arith.constant 1.000000e+00 : f32
      %32 = vector.broadcast %cst_23 : f32 to vector<8x1xf32>
      %33 = arith.maximumf %31, %32 : vector<8x1xf32>
      %34 = tpu.reciprocal %33 : vector<8x1xf32> -> vector<8x1xf32>
      %c0_24 = arith.constant 0 : index
      %c0_25 = arith.constant 0 : index
      %35 = vector.load %arg7[%c0_24, %c0_25] : memref<8x1xf32, #tpu.memory_space<vmem>>, vector<8x1xf32>
      tpu.vector_store %arg7[%c0_24, %c0_25], %34 {strides = array<i32>} : memref<8x1xf32, #tpu.memory_space<vmem>>, vector<8x1xf32>,
      %cst_26 = arith.constant 0.000000e+00 : f32
      %36 = vector.broadcast %cst_26 : f32 to vector<1x1x128xf32>
      %c0_27 = arith.constant 0 : index
      %c0_28 = arith.constant 0 : index
      %c0_29 = arith.constant 0 : index
      %37 = vector.load %arg6[%c0_27, %c0_28, %c0_29] : memref<1x1x128xf32, #tpu.memory_space<vmem>>, vector<1x1x128xf32>
      tpu.vector_store %arg6[%c0_27, %c0_28, %c0_29], %36 {strides = array<i32>} : memref<1x1x128xf32, #tpu.memory_space<vmem>>, vector<1x1x128xf32>,
    } else {
    }
    %cst = arith.constant dense<0.000000e+00> : vector<8x32xf32>
    %11 = tpu.matmul %1, %3, %cst {dimension_numbers = #tpu.dot_dimension_numbers<[1], [0], [0], [1], [0, 0, 1, 1], [], []>} : vector<8x16xbf16>, vector<16x32xbf16>, vector<8x32xf32> -> vector<8x32xf32>
    %c0_12 = arith.constant 0 : index
    %c0_13 = arith.constant 0 : index
    %12 = vector.load %arg7[%c0_12, %c0_13] : memref<8x1xf32, #tpu.memory_space<vmem>>, vector<8x1xf32>
    %13 = vector.broadcast %12 : vector<8x1xf32> to vector<8x32xf32>
    %14 = arith.mulf %11, %13 : vector<8x32xf32>
    %15 = arith.extf %5 : vector<8x32xbf16> to vector<8x32xf32>
    %16 = arith.subf %14, %15 : vector<8x32xf32>
    %17 = arith.mulf %16, %16 : vector<8x32xf32>
    %cst_14 = arith.constant dense<0.000000e+00> : vector<8xf32>
    %18 = vector.multi_reduction <add>, %17, %cst_14 [1] : vector<8x32xf32> to vector<8xf32>
    %19 = vector.shape_cast %18 : vector<8xf32> to vector<8x1xf32>
    %c0_15 = arith.constant 0 : index
    %c0_16 = arith.constant 0 : index
    %c0_17 = arith.constant 0 : index
    %20 = vector.load %arg6[%c0_15, %c0_16, %c0_17] : memref<1x1x128xf32, #tpu.memory_space<vmem>>, vector<1x1x128xf32>
    %21 = arith.mulf %19, %7 : vector<8x1xf32>
    %22 = vector.shape_cast %21 : vector<8x1xf32> to vector<1x8x1xf32>
    %cst_18 = arith.constant dense<0.000000e+00> : vector<1xf32>
    %23 = vector.multi_reduction <add>, %22, %cst_18 [1, 2] : vector<1x8x1xf32> to vector<1xf32>
    %24 = vector.shape_cast %23 : vector<1xf32> to vector<1x1x1xf32>
    %25 = vector.extract %24[0, 0, 0] : f32 from vector<1x1x1xf32>
    %26 = vector.broadcast %25 : f32 to vector<1x1x128xf32>
    %27 = arith.addf %20, %26 : vector<1x1x128xf32>
    %c0_19 = arith.constant 0 : index
    %c0_20 = arith.constant 0 : index
    %c0_21 = arith.constant 0 : index
    %28 = vector.load %arg6[%c0_19, %c0_20, %c0_21] : memref<1x1x128xf32, #tpu.memory_space<vmem>>, vector<1x1x128xf32>
    tpu.vector_store %arg6[%c0_19, %c0_20, %c0_21], %27 {strides = array<i32>} : memref<1x1x128xf32, #tpu.memory_space<vmem>>, vector<1x1x128xf32>,
    return
  }
  func.func @transform_0(%arg0: i32, %arg1: i32) -> (i32, i32, i32) {
    %c0_i32 = arith.constant 0 : i32
    %c0_i32_0 = arith.constant 0 : i32
    return %arg0, %c0_i32, %arg1 : i32, i32, i32
  }
  func.func @transform_1(%arg0: i32, %arg1: i32) -> (i32, i32, i32) {
    %c0_i32 = arith.constant 0 : i32
    %c0_i32_0 = arith.constant 0 : i32
    %c0_i32_1 = arith.constant 0 : i32
    return %arg0, %c0_i32, %c0_i32_0 : i32, i32, i32
  }
  func.func @transform_2(%arg0: i32, %arg1: i32) -> (i32, i32, i32) {
    %c0_i32 = arith.constant 0 : i32
    %c0_i32_0 = arith.constant 0 : i32
    return %arg0, %c0_i32, %arg1 : i32, i32, i32
  }
  func.func @transform_3(%arg0: i32, %arg1: i32) -> (i32, i32, i32) {
    %c0_i32 = arith.constant 0 : i32
    %c0_i32_0 = arith.constant 0 : i32
    %c0_i32_1 = arith.constant 0 : i32
    return %arg0, %c0_i32, %c0_i32_0 : i32, i32, i32
  }
  func.func @transform_4(%arg0: i32, %arg1: i32) -> (i32, i32, i32) {
    %c0_i32 = arith.constant 0 : i32
    %c0_i32_0 = arith.constant 0 : i32
    %c0_i32_1 = arith.constant 0 : i32
    return %arg0, %c0_i32, %c0_i32_0 : i32, i32, i32
  }
}

</mosaic_0001>

<bundles_post_ra>
// kernel: tpu_custom_call.1
= control target key start
LH: loop header
LB: loop body
LE: loop exit
PB: predicated region body
PF: predicated region fallthrough
CT: control target
= control target key end

     0   :  { %9 = vsyncpa [#allocation4], 0  ;;  %s964_s0 = inlined_call_operand.vmem [shape: bf16[2,16,32], index: 0, kind: input, shape index: {}]   ;;  %s965_s1 = inlined_call_operand.hbm [shape: bf16[2,8,16], index: 1, kind: input, shape index: {}]   ;;  %s966_s2 = inlined_call_operand.hbm [shape: bf16[2,8,32], index: 2, kind: input, shape index: {}]   ;;  %s967_s3 = inlined_call_operand.vmem [shape: f32[2,8,1], index: 3, kind: input, shape index: {}]   ;;  %s968_s4 = inlined_call_operand.hbm [shape: f32[2,1,128], index: 4, kind: output, shape index: {}]  }
   0x1   :  { %11 = vsyncpa [#allocation4 + $0x1], 0 }
   0x2   :  { %12 = vsyncpa [#allocation7], 0 }
   0x3   :  { %14 = vsyncpa [#allocation7 + $0x1], 0 }
   0x4   :  { %15 = vsyncpa [#allocation5], 0 }
   0x5   :  { %17 = vsyncpa [#allocation5 + $0x1], 0  ;;  %s815_s15 = smov 0   ;;  %s817_s16 = smov 0  }
   0x6   :  { %s819_s17 = smov 0   ;;  %s821_s18 = smov 0  }
   0x7   :  { %s823_s19 = smov 0   ;;  %s825_s20 = smov 0  }
   0x8 LB: > { %s543_s21 = sadd.s32 4294967295, %s786_s20   ;;  %s544_s22 = sadd.s32 4294967294, %s786_s20   ;;  %s786_s20 = sphi %s825_s20, %s23_s20   ;;  %s782_s19 = sphi %s823_s19, %s980_s19   ;;  %s778_s18 = sphi %s821_s18, %s979_s18   ;;  %s774_s17 = sphi %s819_s17, %s978_s17   ;;  %s770_s16 = sphi %s817_s16, %s977_s16   ;;  %s766_s15 = sphi %s815_s15, %s976_s15  }
   0x9   : > { %s35_s23 = sadd.s32 1, %s782_s19  ;;  %s70_s24 = sadd.s32 1, %s774_s17 }
   0xa   : > { %p37_p0 = scmp.ge.s32.totalorder %s35_s23, 2  ;;  %p77_p1 = scmp.ne.s32.totalorder %s774_s17, %s770_s16 }
   0xb   : > { %p78_p2 = scmp.eq.s32.totalorder %s786_s20, 0  ;;  %p83_p3 = scmp.ne.s32.totalorder %s770_s16, %s766_s15 }
   0xc   : > { %s982_s23 = smov (%p37_p0, %s35_s23), 0  ;;  %p84_p5 = scmp.eq.s32.totalorder %s543_s21, 0 }
   0xd   : > { %970 = sst [smem:[#allocation12_spill]] %s982_s23  ;;  %p856_p4 = por %p78_p2, %p77_p1 }
   0xe   : > { %s67_s26 = ssub.s32 %s782_s19, %s982_s23  ;;  %p161_p6 = scmp.eq.s32.totalorder %s543_s21, 1 }
   0xf   : > { %p68_p7 = scmp.eq.s32.totalorder %s67_s26, 0  ;;  %p862_p8 = por %p84_p5, %p83_p3 }
  0x10   : > { %p866_p9 = por %p161_p6, %p77_p1  ;;  %p167_p10 = scmp.eq.s32.totalorder %s544_s22, 1 }
  0x11   : > { %s871_s29 = scalar_select %p68_p7, %s774_s17, %s70_s24  }
  0x12   : > { %p873_p11 = por %p167_p10, %p83_p3  ;;  %p546_p12 = scmp.ge.s32.totalorder %s786_s20, 2 }
  0x13   : > { %p585_p13 = scmp.lt.s32.totalorder %s786_s20, 2  ;;  %s198_s5 = sand.u32 1, %s774_s17  }
  0x14   : > { %s547_s6 = sshll.u32 %s198_s5, 2  ;;  %s548_s7 = sshll.u32 %s782_s19, 2 }
  0x15   : > { %s206_s10 = scalar_lea.hbm %s965_s1, %s548_s7  ;;  %s202_s11 = scalar_lea.vmem [#allocation3], %s547_s6 }
  0x16   : > { %s210_s12 = sshll.u32 %s202_s11, 4  ;;  %s208_s13 = sshll.u32 %s206_s10, 4  ;;  %s211_s12 = int_to_ptr.vmem [resolvable:$true] %s210_s12  ;;  %s209_s13 = int_to_ptr.hbm [resolvable:$true] %s208_s13 }
  0x17   : > { %p575_p0 = pnand %p585_p13, %p856_p4  ;;  %p551_p1 = scmp.ge.s32.totalorder %s786_s20, 1 }
  0x18   : > { %p242_p2 = scmp.lt.s32.totalorder %s786_s20, 3  ;;  %s199_s14 = scalar_lea.sflag [#allocation4], %s198_s5 }
  0x19   : > { %577 = dma.hbm_to_vmem [thread:$0]  (!%p575_p0), %s209_s13, 64, %s211_s12, %s199_s14  }
  0x1a   : > { %p243_p3 = pnand %p551_p1, %p242_p2  ;;  %s226_s24 = scalar_lea.hbm %s966_s2, %s548_s7 }
  0x1b   : > { %s221_s26 = scalar_lea.vmem [#allocation6], %s547_s6  ;;  %s228_s8 = sshll.u32 %s226_s24, 4  ;;  %s229_s8 = int_to_ptr.hbm [resolvable:$true] %s228_s8 }
  0x1c   : > { %s230_s23 = sshll.u32 %s221_s26, 4  ;;  %s218_s9 = scalar_lea.sflag [#allocation7], %s198_s5  ;;  %s231_s23 = int_to_ptr.vmem [resolvable:$true] %s230_s23 }
  0x1d   : > { %580 = dma.hbm_to_vmem [thread:$0]  (!%p575_p0), %s229_s8, 64, %s231_s23, %s218_s9  }
  0x1e   : > { %246 = sbr.rel (%p243_p3) target bundleno = 610 (0x262), region = 36  ;;  %s892_s25 = sand.u32 (!%p243_p3), 1, %s770_s16  }
  0x1f   : > { %s552_s10 = sshll.u32 (!%p243_p3), %s892_s25, 2  ;;  %s249_s11 = scalar_lea.sflag (!%p243_p3), [#allocation4], %s892_s25 }
  0x20   : > { %s252_s12 = scalar_lea.vmem (!%p243_p3), [#allocation3], %s552_s10 }
  0x23   : > { %753 = dma.done.wait (%p862_p8), %s249_s11, 64  }
  0x24   : > { %755 = vsyncadd (%p862_p8), %s249_s11, 4294967232  ;;  %s259_s6 = scalar_lea.sflag [#allocation7], %s892_s25  ;;  %s901_s5 = scalar_lea.vmem [#allocation6], %s552_s10 }
  0x25   : > { %757 = dma.done.wait (%p862_p8), %s259_s6, 64  }
  0x26   : > { %759 = vsyncadd (%p862_p8), %s259_s6, 4294967232  ;;  %v317_v0 = vld [vmem:[%s252_s12] sm:$0xf]  ;;  %vm327_vm0 = vcmask 130048   ;;  %p304_p4 = scmp.lt.s32.totalorder %s778_s18, 1  ;;  %v788_v4 = vmov 0   ;;  %s411_s10 = scalar_lea.hbm %s968_s4, %s778_s18 }
  0x27   : > { %v326_v1 = vunpack.c.l.bf16 %v317_v0  ;;  %637 = vset.pattern.permute.xlu0 %v788_v4  ;;  %vm346_vm3 = vcmask 7168   ;;  %v320_v20 = vld [vmem:[%s901_s5] sm:$0xf]  ;;  %vm382_vm6 = vcmask 261120   ;;  %s303_s26 = scalar_lea.vmem [#allocation8], %s892_s25  ;;  %v789_v31 = vmov 0.0  }
  0x28   : > { %s909_s23 = scalar_select %p304_p4, %s778_s18, 1  ;;  %v379_v21 = vunpack.c.l.bf16 %v320_v20  ;;  %348 = vst [vmem:[%s303_s26] sm:$0x1] %v789_v31 }
  0x29   : > { %v328_v2 = vsel %vm327_vm0, %v326_v1, 0.0  ;;  %s413_s11 = sshll.u32 %s303_s26, 4  ;;  %s415_s12 = sshll.u32 %s411_s10, 4  ;;  %s414_s11 = int_to_ptr.vmem [resolvable:$true] %s413_s11  ;;  %s416_s12 = int_to_ptr.hbm [resolvable:$true] %s415_s12 }
  0x2a   : > { %329 = vadd.xlane.f32.xlu0 %v328_v2  ;;  %s564_s7 = sshll.u32 %s909_s23, 3  ;;  %s403_s5 = scalar_lea.sflag [#allocation5], %s892_s25 }
  0x2b   : > { %s311_s21 = scalar_lea.vmem %s964_s0, %s564_s7  ;;  %s315_s24 = scalar_lea.vmem %s967_s3, %s564_s7 }
  0x2c   : > { %v565_v3 = vld [vmem:[%s311_s21] sm:$0xff]  ;;  %s714_s23 = sshra.s32 %s416_s12, 4  ;;  %s720_s18 = scalar_lea.hbm %s968_s4, 2  ;;  %s715_s23 = int_to_ptr.hbm [resolvable:$true] %s714_s23 }
  0x2d   : > { %366 = vmatpush.bf16.msra.mxu0 %v565_v3  ;;  %v321_v27 = vld [vmem:[%s315_s24] sm:$0xff]  ;;  %s716_s7 = scalar_lea.hbm %s715_s23, 1  ;;  %p721_p8 = scmp.lt.s32.totalorder %s715_s23, %s968_s4 }
  0x2e   : > { %p717_p5 = scmp.ne.s32.totalorder %s715_s23, %s716_s7  ;;  %p722_p10 = scmp.lt.s32.totalorder %s720_s18, %s716_s7 }
  0x2f   : > { %v386_v39 = vld [vmem:[%s303_s26] sm:$0x1] }
  0x30   : > { %561 = vmatmul.msk.bf16.vlgmr.msra.gmra.mxu0 %vm327_vm0, %v317_v0  ;;  %p718_p6 = pnand %p717_p5, %p866_p9  ;;  %p723_p13 = por %p722_p10, %p721_p8 }
  0x32   : > { %p719_p7 = pneg %p718_p6 }
  0x34   : > { %p724_p0 = pnand %p723_p13, %p719_p7 }
  0x9d   : > { %v330_v5 = vpop.xlane.xlu0 %329 }
  0x9e   : > { %v331_v6 = vmax.f32 %v330_v5, 1.0 }
  0xa0   : > { %638 = vrcp.f32 %v331_v6  ;;  %v343_v10 = vand.u32 2147483648, %v331_v6  ;;  %v341_v12 = vand.u32 2147483647, %v331_v6  ;;  %vm337_vm2 = vweird.f32 %v331_v6 }
  0xa2   : > { %v344_v14 = vor.u32 1.1754944e-38, %v343_v10  ;;  %vm342_vm5 = vcmp.eq.f32.partialorder %v341_v12, 8.507059e+37 }
  0xa6   : > { %v639_v7 = vpop.eup %638 }
  0xa7   : > { %v333_v8 = vmul.f32 %v639_v7, %v331_v6  ;;  %vm338_vm1 = vweird.f32 %v639_v7 }
  0xa8   : > { %vm339_vm4 = vmor %vm337_vm2, %vm338_vm1 }
  0xa9   : > { %v334_v9 = vsub.f32 1.0, %v333_v8 }
  0xab   : > { %v335_v11 = vmul.f32 %v639_v7, %v334_v9 }
  0xad   : > { %v336_v13 = vadd.f32 %v639_v7, %v335_v11  ;;  %v368_v18 = vpop.f32.mrf.mxu0 }
  0xaf   : > { %v340_v15 = vsel %vm339_vm4, %v639_v7, %v336_v13 }
  0xb0   : > { %v345_v16 = vsel %vm342_vm5, %v344_v14, %v340_v15 }
  0xb1   : > { %347 = vst.msk [vmem:[#allocation2] sm:$0xff] %vm346_vm3, %v345_v16 }
  0xb5   : > { %v370_v19 = vpop.f32.mrf.mxu0 }
  0xb8   : > { %v372_v17 = vld [vmem:[#allocation2] sm:$0xff] }
  0xb9   : > { %375 = vperm.xlu0 %637, %v372_v17  }
 0x12b   : > { %v376_v22 = vpop.permute.xlu0 %375 }
 0x12c   : > { %v378_v23 = vmul.f32 %v376_v22, %v368_v18 }
 0x12e   : > { %v380_v24 = vsub.f32 %v378_v23, %v379_v21 }
 0x130   : > { %v381_v25 = vmul.f32 %v380_v24, %v380_v24 }
 0x132   : > { %v383_v26 = vsel %vm382_vm6, %v381_v25, 0.0 }
 0x133   : > { %384 = vadd.xlane.f32.xlu1 %v383_v26 }
 0x1a6   : > { %v385_v28 = vpop.xlane.xlu1 %384 }
 0x1a7   : > { %v387_v29 = vmul.f32 %v385_v28, %v321_v27 }
 0x1a9   : > { %v389_v30 = vsel %vm346_vm3, %v387_v29, 0.0 }
 0x1aa   : > { %390 = vadd.xlane.f32.xlu1 %v389_v30 }
 0x21d   : > { %v391_v32 = vpop.xlane.xlu1 %390 }
 0x21e   : > { %v392_v33 = vrot.slane %v391_v32, 4 }
 0x220   : > { %v393_v34 = vadd.f32 %v392_v33, %v391_v32 }
 0x222   : > { %v394_v35 = vrot.slane %v393_v34, 2 }
 0x224   : > { %v395_v36 = vadd.f32 %v394_v35, %v393_v34 }
 0x226   : > { %v396_v37 = vrot.slane %v395_v36, 1 }
 0x228   : > { %v397_v38 = vadd.f32 %v396_v37, %v395_v36 }
 0x22a   : > { %566 = vpush %v397_v38 }
 0x25b   : > { %s567_s6 = spop %566 }
 0x25c   : > { %v399_v40 = vstv %s567_s6 }
 0x25d   : > { %v400_v41 = vadd.f32 %v399_v40, %v386_v39 }
 0x25f   : > { %401 = vst [vmem:[%s303_s26] sm:$0x1] %v400_v41 }
 0x260   : > { %727 = shalt.err (!%p724_p0)
}
 0x261   : > { %572 = dma.vmem_to_hbm [thread:$0]  (%p866_p9), %s414_s11, 16, %s416_s12, %s403_s5  }
 0x262 PF: > { %s427_s25 = sand.u32 1, %s766_s15   ;;  %p582_p1 = pnand %p546_p12, %p873_p11 }
 0x263   : > { %s428_s22 = scalar_lea.sflag [#allocation5], %s427_s25 }
 0x264   : > { %p583_p2 = pneg %p582_p1 }
 0x266   : > { %761 = dma.done.wait (%p583_p2), %s428_s22, 16  }
 0x267   : > { %763 = vsyncadd (%p583_p2), %s428_s22, 4294967280  ;;  %s23_s20 = sadd.s32 1, %s786_s20   ;;  %s975_s28 = sld [smem:[#allocation12_spill]] }
 0x268   : > { %p20_p3 = scmp.ge.s32.totalorder %s23_s20, 4   ;;  %s976_s15 = smov %s770_s16 }
 0x269   : > { %s977_s16 = smov %s774_s17  ;;  %s978_s17 = smov %s871_s29 }
 0x26a   : > { %s979_s18 = smov %s782_s19  ;;  %22 = sbr.rel (!%p20_p3) target bundleno = 8 (0x8), region = 104 }
 0x26d   : > { %s980_s19 = smov %s975_s28 }
 0x26f   :  { %433 = vsyncpa [#allocation4], 1 }
 0x270   :  { %435 = vsyncpa [#allocation4 + $0x1], 1 }
 0x271   :  { %436 = vsyncpa [#allocation7], 1 }
 0x272   :  { %438 = vsyncpa [#allocation7 + $0x1], 1 }
 0x273   :  { %439 = vsyncpa [#allocation5], 1 }
 0x274   :  { %441 = vsyncpa [#allocation5 + $0x1], 1 }

</bundles_post_ra>
